<compile_context>
chip_gen: v6e
topology: v6e:2x2x1
jax: 0.10.0
libtpu: 0.0.40
codegen_flags: <defaults>
</compile_context>

<pallas_src>
import math
from functools import partial

import jax
import jax.numpy as jnp
from jax.experimental import pallas as pl
from jax.experimental.pallas import tpu as pltpu


# ------------------------------ helpers -------------------------------------

def _pick_tile(dim: int, pref: int) -> int:
    """Largest power-of-two tile <= pref that divides dim (else the full dim)."""
    if dim <= pref:
        return dim
    t = pref
    while t > 1:
        if dim % t == 0:
            return t
        t //= 2
    return dim


# --------------------------- tiled GEMM kernel -------------------------------

def _matmul_kernel(x_ref, w_ref, o_ref, acc_ref):
    # x: (tm, tk) bf16, w: (tk, tn) bf16, acc: (tm, tn) f32 resident across K.
    @pl.when(pl.program_id(2) == 0)
    def _init():
        acc_ref[...] = jnp.zeros_like(acc_ref)

    acc_ref[...] += jnp.dot(x_ref[...], w_ref[...],
                            preferred_element_type=jnp.float32)

    @pl.when(pl.program_id(2) == pl.num_programs(2) - 1)
    def _store():
        o_ref[...] = acc_ref[...].astype(o_ref.dtype)


def linear(x2d: jax.Array, w: jax.Array, out_dtype=jnp.float32,
           tm: int = 256, tn: int = 256, tk: int = 512) -> jax.Array:
    """y = x2d @ w, tiled/pipelined on the MXU (bf16 in, f32 accumulate).

    Tile defaults sized so 2x-double-buffered bf16 blocks stay well inside
    v7x's 64 MiB VMEM (and v5e's smaller scoped default).
    """
    M, K = x2d.shape
    K2, N = w.shape
    assert K == K2
    tm = _pick_tile(M, tm)
    tn = _pick_tile(N, tn)
    tk = _pick_tile(K, tk)
    grid = (M // tm, N // tn, K // tk)
    return pl.pallas_call(
        _matmul_kernel,
        out_shape=jax.ShapeDtypeStruct((M, N), out_dtype),
        grid=grid,
        in_specs=[
            pl.BlockSpec((tm, tk), lambda i, j, k: (i, k)),
            pl.BlockSpec((tk, tn), lambda i, j, k: (k, j)),
        ],
        out_specs=pl.BlockSpec((tm, tn), lambda i, j, k: (i, j)),
        scratch_shapes=[pltpu.VMEM((tm, tn), jnp.float32)],
        compiler_params=pltpu.CompilerParams(
            dimension_semantics=("parallel", "parallel", "arbitrary"),
            vmem_limit_bytes=64 * 1024 * 1024,
        ),
    )(x2d, w)


# --------------------- in-place KV-cache update kernel -----------------------

def _kv_update_kernel(newk_ref, newv_ref, ck_in, cv_in, ck_out, cv_out, sem,
                      *, start_pos, seqlen):
    # Caches live in HBM (pl.ANY) and are aliased input->output: only the new
    # (S, D) rows for this (batch, kv_head) are DMA'd, not the whole cache.
    del ck_in, cv_in
    b = pl.program_id(0)
    g = pl.program_id(1)
    dst_k = ck_out.at[b, g, pl.ds(start_pos, seqlen), :]
    dst_v = cv_out.at[b, g, pl.ds(start_pos, seqlen), :]
    cpk = pltpu.make_async_copy(newk_ref.at[0, 0], dst_k, sem.at[0])
    cpv = pltpu.make_async_copy(newv_ref.at[0, 0], dst_v, sem.at[1])
    cpk.start()
    cpv.start()
    cpk.wait()
    cpv.wait()


def kv_cache_update(cache_k, cache_v, new_k, new_v, start_pos: int):
    """Write new_k/new_v (B, KH, S, D) into caches (Bmax, KH, Tmax, D) at start_pos."""
    B, KH, S, D = new_k.shape
    kern = partial(_kv_update_kernel, start_pos=start_pos, seqlen=S)
    return pl.pallas_call(
        kern,
        out_shape=(jax.ShapeDtypeStruct(cache_k.shape, cache_k.dtype),
                   jax.ShapeDtypeStruct(cache_v.shape, cache_v.dtype)),
        grid=(B, KH),
        in_specs=[
            pl.BlockSpec((1, 1, S, D), lambda b, g: (b, g, 0, 0)),
            pl.BlockSpec((1, 1, S, D), lambda b, g: (b, g, 0, 0)),
            pl.BlockSpec(memory_space=pl.ANY),   # cache_k (aliased to output 0)
            pl.BlockSpec(memory_space=pl.ANY),   # cache_v (aliased to output 1)
        ],
        out_specs=(pl.BlockSpec(memory_space=pl.ANY),
                   pl.BlockSpec(memory_space=pl.ANY)),
        scratch_shapes=[pltpu.SemaphoreType.DMA((2,))],
        input_output_aliases={2: 0, 3: 1},
    )(new_k, new_v, cache_k, cache_v)


# ------------------- flash-style attention core (GQA) ------------------------

def _flash_attn_kernel(q_ref, k_ref, v_ref, o_ref, m_sc, l_sc, acc_sc):
    # q_ref: (1, 1, n_rep*S, D) bf16, pre-scaled by 1/sqrt(D)
    # k_ref/v_ref: (1, 1, tkv, D) bf16 -- one KV tile of the shared group cache
    # o_ref: (1, 1, n_rep*S, D) bf16, resident across the KV-tile axis
    t = pl.program_id(2)

    @pl.when(t == 0)
    def _init():
        m_sc[...] = jnp.full(m_sc.shape, -jnp.inf, m_sc.dtype)
        l_sc[...] = jnp.zeros_like(l_sc)
        acc_sc[...] = jnp.zeros_like(acc_sc)

    q = q_ref[0, 0]          # (n_rep*S, D)
    k = k_ref[0, 0]          # (tkv, D)
    v = v_ref[0, 0]          # (tkv, D)

    # contract head_dim directly (no explicit k.T / relayout)
    s = jax.lax.dot_general(q, k, (((1,), (1,)), ((), ())),
                            preferred_element_type=jnp.float32)  # (n_rep*S, tkv)

    m_prev = m_sc[...]
    m_new = jnp.maximum(m_prev, jnp.max(s, axis=-1, keepdims=True))
    alpha = jnp.exp(m_prev - m_new)
    p = jnp.exp(s - m_new)

    l_sc[...] = alpha * l_sc[...] + jnp.sum(p, axis=-1, keepdims=True)
    pv = jax.lax.dot_general(p.astype(v.dtype), v, (((1,), (0,)), ((), ())),
                             preferred_element_type=jnp.float32)  # (n_rep*S, D)
    acc_sc[...] = alpha * acc_sc[...] + pv
    m_sc[...] = m_new

    @pl.when(t == pl.num_programs(2) - 1)
    def _finalize():
        inv_l = pl.reciprocal(l_sc[...], approx=True)   # EUP, not VALU divide
        o_ref[0, 0] = (acc_sc[...] * inv_l).astype(o_ref.dtype)


def attention_core(q, k_cache, v_cache, kv_len: int, *, tkv_pref: int = 512):
    """q: (B, KH, n_rep*S, D); caches: (Bmax, KH, Tmax, D) -> (B, KH, n_rep*S, D)."""
    B, KH, MS, D = q.shape
    assert kv_len <= k_cache.shape[2]
    tkv = _pick_tile(kv_len, tkv_pref)
    grid = (B, KH, kv_len // tkv)
    return pl.pallas_call(
        _flash_attn_kernel,
        out_shape=jax.ShapeDtypeStruct((B, KH, MS, D), q.dtype),
        grid=grid,
        in_specs=[
            pl.BlockSpec((1, 1, MS, D), lambda b, g, t: (b, g, 0, 0)),
            pl.BlockSpec((1, 1, tkv, D), lambda b, g, t: (b, g, t, 0)),
            pl.BlockSpec((1, 1, tkv, D), lambda b, g, t: (b, g, t, 0)),
        ],
        out_specs=pl.BlockSpec((1, 1, MS, D), lambda b, g, t: (b, g, 0, 0)),
        scratch_shapes=[
            pltpu.VMEM((MS, 1), jnp.float32),   # running max
            pltpu.VMEM((MS, 1), jnp.float32),   # running denom
            pltpu.VMEM((MS, D), jnp.float32),   # output accumulator
        ],
        compiler_params=pltpu.CompilerParams(
            dimension_semantics=("parallel", "parallel", "arbitrary"),
            vmem_limit_bytes=64 * 1024 * 1024,
        ),
    )(q, k_cache, v_cache)


# ------------------------------- JAX glue ------------------------------------

def apply_rotary_pos_embedding(x, freqs, scale: float = 1.0, out_dtype=None):
    """x: (B, S, H, D); freqs: (S, D//2) angles. Pairs are (x[...,2i], x[...,2i+1]).

    `scale` lets us fold the 1/sqrt(head_dim) attention scale into q here
    (one elementwise pass on data already being touched).
    TODO(synk): fuse RoPE into the fused-QKV kernel epilogue to save one
                activation HBM round trip.
    """
    cos = jnp.cos(freqs)[None, :, None, :]
    sin = jnp.sin(freqs)[None, :, None, :]
    xf = x.astype(jnp.float32)
    xr = xf[..., 0::2]
    xi = xf[..., 1::2]
    out_r = (xr * cos - xi * sin) * scale
    out_i = (xr * sin + xi * cos) * scale
    out = jnp.stack([out_r, out_i], axis=-1).reshape(x.shape)
    return out.astype(out_dtype if out_dtype is not None else x.dtype)


class AttentionPallas:
    def __init__(self, dim, n_heads, n_kv_heads, max_batch_size, max_seq_len, key):
        self.dim = dim
        self.n_heads_q = n_heads
        self.n_kv_heads = n_kv_heads
        self.n_rep = n_heads // n_kv_heads
        self.head_dim = dim // n_heads
        self.max_seq_len = max_seq_len

        k1, k2, k3, k4 = jax.random.split(key, 4)
        std = 0.02
        # nn.Linear(in, out, bias=False) stores (out, in); we keep W^T = (in, out).
        wq = std * jax.random.normal(k1, (dim, n_heads * self.head_dim), jnp.float32)
        wk = std * jax.random.normal(k2, (dim, n_kv_heads * self.head_dim), jnp.float32)
        wv = std * jax.random.normal(k3, (dim, n_kv_heads * self.head_dim), jnp.float32)
        wo = std * jax.random.normal(k4, (n_heads * self.head_dim, dim), jnp.float32)

        # bf16 weights for the MXU (kernels accumulate in f32).
        self.wq = wq.astype(jnp.bfloat16)
        self.wk = wk.astype(jnp.bfloat16)
        self.wv = wv.astype(jnp.bfloat16)
        self.wo = wo.astype(jnp.bfloat16)
        # fused QKV weight: x is read from HBM once instead of three times.
        self.w_qkv = jnp.concatenate([self.wq, self.wk, self.wv], axis=1)

        # KV cache head-major (B, KH, T, D), bf16: attention streams
        # (b, kv_head, t-tile) blocks straight from the persistent cache.
        self.cache_k = jnp.zeros(
            (max_batch_size, n_kv_heads, max_seq_len, self.head_dim), jnp.bfloat16)
        self.cache_v = jnp.zeros_like(self.cache_k)

    def forward(self, x: jax.Array, freqs: jax.Array, start_pos: int) -> jax.Array:
        B, S, _ = x.shape
        H, KH, D, n_rep = self.n_heads_q, self.n_kv_heads, self.head_dim, self.n_rep

        x2d = x.reshape(B * S, self.dim).astype(jnp.bfloat16)

        # fused QKV projection (tiled, pipelined GEMM; f32 accumulate/output)
        qkv = linear(x2d, self.w_qkv, out_dtype=jnp.float32)  # (B*S, (H+2KH)*D)
        q_end = H * D
        k_end = q_end + KH * D
        xq = qkv[:, :q_end].reshape(B, S, H, D)
        xk = qkv[:, q_end:k_end].reshape(B, S, KH, D)
        xv = qkv[:, k_end:].reshape(B, S, KH, D)

        # RoPE in f32; 1/sqrt(D) folded into q so the score matmul needs no
        # per-(S,T) rescale.
        scale = 1.0 / math.sqrt(D)
        xq = apply_rotary_pos_embedding(xq, freqs, scale=scale, out_dtype=jnp.bfloat16)
        xk = apply_rotary_pos_embedding(xk, freqs, out_dtype=jnp.bfloat16)
        xv = xv.astype(jnp.bfloat16)

        # new-token K/V -> head-major (tiny copies: current step only)
        xk_t = jnp.transpose(xk, (0, 2, 1, 3))   # (B, KH, S, D)
        xv_t = jnp.transpose(xv, (0, 2, 1, 3))

        # in-place cache write (aliased Pallas DMA; donate caches under jit)
        self.cache_k, self.cache_v = kv_cache_update(
            self.cache_k, self.cache_v, xk_t, xv_t, start_pos)

        # queries packed per GQA group: (B, KH, n_rep*S, D); one grid cell
        # handles a whole group and shares its KV block (no repeat_kv).
        q = jnp.transpose(xq, (0, 2, 1, 3)).reshape(B, KH, n_rep * S, D)

        kv_len = start_pos + S
        o = attention_core(q, self.cache_k, self.cache_v, kv_len)  # (B, KH, n_rep*S, D)

        # back to (tokens, H*D) for the output projection
        # (at real head_dim=128 the attention output block is already lane-dense)
        o = o.reshape(B, KH, n_rep, S, D)
        o = jnp.transpose(o, (0, 3, 1, 2, 4)).reshape(B * S, H * D)
        out = linear(o, self.wo, out_dtype=jnp.float32)
        return out.reshape(B, S, self.dim)


# ------------------------------- reference -----------------------------------

def reference_forward(attn: AttentionPallas, x, freqs, start_pos):
    """Pure-JAX f32 reference with the intended LLaMA cache semantics."""
    B, S, _ = x.shape
    H, KH, D, n_rep = attn.n_heads_q, attn.n_kv_heads, attn.head_dim, attn.n_rep
    wq = attn.wq.astype(jnp.float32)
    wk = attn.wk.astype(jnp.float32)
    wv = attn.wv.astype(jnp.float32)
    wo = attn.wo.astype(jnp.float32)

    x2d = x.reshape(B * S, -1)
    xq = (x2d @ wq).reshape(B, S, H, D)
    xk = (x2d @ wk).reshape(B, S, KH, D)
    xv = (x2d @ wv).reshape(B, S, KH, D)
    xq = apply_rotary_pos_embedding(xq, freqs)
    xk = apply_rotary_pos_embedding(xk, freqs)

    cache_k = jnp.zeros((B, attn.max_seq_len, KH, D), jnp.float32)
    cache_v = jnp.zeros_like(cache_k)
    cache_k = jax.lax.dynamic_update_slice(cache_k, xk, (0, start_pos, 0, 0))
    cache_v = jax.lax.dynamic_update_slice(cache_v, xv, (0, start_pos, 0, 0))
    keys = jnp.repeat(cache_k[:, : start_pos + S], n_rep, axis=2)    # (B, T, H, D)
    values = jnp.repeat(cache_v[:, : start_pos + S], n_rep, axis=2)

    q = jnp.transpose(xq, (0, 2, 1, 3))
    k = jnp.transpose(keys, (0, 2, 1, 3))
    v = jnp.transpose(values, (0, 2, 1, 3))
    s = jnp.einsum("bhsd,bhtd->bhst", q, k) / math.sqrt(D)
    p = jax.nn.softmax(s.astype(jnp.float32), axis=-1)
    o = jnp.einsum("bhst,bhtd->bhsd", p, v)
    o = jnp.transpose(o, (0, 2, 1, 3)).reshape(B * S, H * D)
    return (o @ wo).reshape(B, S, attn.dim)


# --------------------------------- main ---------------------------------------

if __name__ == "__main__":
    dim = 64
    n_heads = 4
    n_kv_heads = 2
    head_dim = dim // n_heads           # 16
    batch = 2
    seq = 16
    max_seq_len = 32
    start_pos = 0

    key = jax.random.PRNGKey(0)
    k_param, k_x = jax.random.split(key)

    attn = AttentionPallas(dim, n_heads, n_kv_heads, batch, max_seq_len, k_param)
    x = jax.random.normal(k_x, (batch, seq, dim), jnp.float32)

    # Precomputed rotary angles (= angle of freqs_complex):
    # theta_i = 10000^(-2i/head_dim), angles = pos * theta_i -> (seq, head_dim//2)
    theta = 10000.0 ** (-jnp.arange(0, head_dim, 2, dtype=jnp.float32) / head_dim)
    pos = jnp.arange(start_pos, start_pos + seq, dtype=jnp.float32)
    freqs = jnp.outer(pos, theta)

    out = attn.forward(x, freqs, start_pos)
    out = jax.block_until_ready(out)

    ref = reference_forward(attn, x, freqs, start_pos)
    assert out.shape == (batch, seq, dim)
    # bf16 matmuls + approximate reciprocal => moderate tolerance vs f32 reference
    assert jnp.allclose(out, ref, atol=2e-2, rtol=2e-2), "mismatch vs JAX reference"

    print("KERNEL_OK")
</pallas_src>

<mosaic_0001>
module attributes {stable_mosaic.version = 11 : i64} {
  func.func @_matmul_kernel(%arg0: i32, %arg1: i32, %arg2: i32, %arg3: memref<32x64xbf16, #tpu.memory_space<vmem>>, %arg4: memref<64x128xbf16, #tpu.memory_space<vmem>>, %arg5: memref<32x128xf32, #tpu.memory_space<vmem>>, %arg6: memref<32x128xf32, #tpu.memory_space<vmem>>) attributes {dimension_semantics = [#tpu.dimension_semantics<parallel>, #tpu.dimension_semantics<parallel>, #tpu.dimension_semantics<arbitrary>], iteration_bounds = array<i64: 1, 1, 1>, scalar_prefetch = 0 : i64, scratch_operands = 1 : i64, tpu.core_type = #tpu.core_type<tc>, window_params = [{transform_indices = @transform_0, window_bounds = array<i64: 32, 64>}, {transform_indices = @transform_1, window_bounds = array<i64: 64, 128>}, {transform_indices = @transform_2, window_bounds = array<i64: 32, 128>}]} {
    %c0_i32 = arith.constant 0 : i32
    %0 = arith.cmpi eq, %arg2, %c0_i32 : i32
    %1 = arith.extui %0 : i1 to i32
    %c0_i32_0 = arith.constant 0 : i32
    %2 = arith.cmpi ne, %1, %c0_i32_0 : i32
    scf.if %2 {
      %cst_10 = arith.constant 0.000000e+00 : f32
      %12 = vector.broadcast %cst_10 : f32 to vector<32x128xf32>
      %c0_11 = arith.constant 0 : index
      %c0_12 = arith.constant 0 : index
      %13 = vector.load %arg6[%c0_11, %c0_12] : memref<32x128xf32, #tpu.memory_space<vmem>>, vector<32x128xf32>
      tpu.vector_store %arg6[%c0_11, %c0_12], %12 {strides = array<i32>} : memref<32x128xf32, #tpu.memory_space<vmem>>, vector<32x128xf32>,
    } else {
    }
    %c0 = arith.constant 0 : index
    %c0_1 = arith.constant 0 : index
    %3 = vector.load %arg6[%c0, %c0_1] : memref<32x128xf32, #tpu.memory_space<vmem>>, vector<32x128xf32>
    %c0_2 = arith.constant 0 : index
    %c0_3 = arith.constant 0 : index
    %4 = vector.load %arg3[%c0_2, %c0_3] : memref<32x64xbf16, #tpu.memory_space<vmem>>, vector<32x64xbf16>
    %c0_4 = arith.constant 0 : index
    %c0_5 = arith.constant 0 : index
    %5 = vector.load %arg4[%c0_4, %c0_5] : memref<64x128xbf16, #tpu.memory_space<vmem>>, vector<64x128xbf16>
    %cst = arith.constant dense<0.000000e+00> : vector<32x128xf32>
    %6 = tpu.matmul %4, %5, %cst {dimension_numbers = #tpu.dot_dimension_numbers<[1], [0], [0], [1], [0, 0, 1, 1], [], []>} : vector<32x64xbf16>, vector<64x128xbf16>, vector<32x128xf32> -> vector<32x128xf32>
    %7 = arith.addf %3, %6 : vector<32x128xf32>
    %c0_6 = arith.constant 0 : index
    %c0_7 = arith.constant 0 : index
    %8 = vector.load %arg6[%c0_6, %c0_7] : memref<32x128xf32, #tpu.memory_space<vmem>>, vector<32x128xf32>
    tpu.vector_store %arg6[%c0_6, %c0_7], %7 {strides = array<i32>} : memref<32x128xf32, #tpu.memory_space<vmem>>, vector<32x128xf32>,
    %c0_i32_8 = arith.constant 0 : i32
    %9 = arith.cmpi eq, %arg2, %c0_i32_8 : i32
    %10 = arith.extui %9 : i1 to i32
    %c0_i32_9 = arith.constant 0 : i32
    %11 = arith.cmpi ne, %10, %c0_i32_9 : i32
    scf.if %11 {
      %c0_10 = arith.constant 0 : index
      %c0_11 = arith.constant 0 : index
      %12 = vector.load %arg6[%c0_10, %c0_11] : memref<32x128xf32, #tpu.memory_space<vmem>>, vector<32x128xf32>
      %c0_12 = arith.constant 0 : index
      %c0_13 = arith.constant 0 : index
      %13 = vector.load %arg5[%c0_12, %c0_13] : memref<32x128xf32, #tpu.memory_space<vmem>>, vector<32x128xf32>
      tpu.vector_store %arg5[%c0_12, %c0_13], %12 {strides = array<i32>} : memref<32x128xf32, #tpu.memory_space<vmem>>, vector<32x128xf32>,
    } else {
    }
    return
  }
  func.func @transform_0(%arg0: i32, %arg1: i32, %arg2: i32) -> (i32, i32) {
    %c0_i32 = arith.constant 0 : i32
    return %arg0, %arg2 : i32, i32
  }
  func.func @transform_1(%arg0: i32, %arg1: i32, %arg2: i32) -> (i32, i32) {
    %c0_i32 = arith.constant 0 : i32
    return %arg2, %arg1 : i32, i32
  }
  func.func @transform_2(%arg0: i32, %arg1: i32, %arg2: i32) -> (i32, i32) {
    %c0_i32 = arith.constant 0 : i32
    return %arg0, %arg1 : i32, i32
  }
}

</mosaic_0001>

<bundles_post_ra>
// kernel: tpu_custom_call.1
= control target key start
LH: loop header
LB: loop body
LE: loop exit
PB: predicated region body
PF: predicated region fallthrough
CT: control target
= control target key end

     0   :  { %7 = vsyncpa [#allocation4], 0  ;;  %s328_s0 = inlined_call_operand.hbm [shape: bf16[32,64], index: 0, kind: input, shape index: {}]   ;;  %s329_s1 = inlined_call_operand.hbm [shape: bf16[64,128], index: 1, kind: input, shape index: {}]   ;;  %s330_s2 = inlined_call_operand.hbm [shape: f32[32,128], index: 2, kind: output, shape index: {}]  }
   0x1   :  { %8 = vsyncpa [#allocation7], 0 }
   0x2   :  { %9 = vsyncpa [#allocation5], 0  ;;  %s297_s9 = smov [#allocation3]  }
   0x3   :  { %s15_s10 = sshll.u32 %s297_s9, 4  ;;  %s16_s10 = int_to_ptr.vmem [resolvable:$true] %s15_s10 }
   0x4   :  { %s239_s11 = scalar_lea.vmem %s16_s10, 256  ;;  %p244_p1 = scmp.lt.s32.totalorder %s16_s10, %s16_s10 }
   0x5   :  { %p240_p0 = scmp.ne.s32.totalorder %s16_s10, %s239_s11  ;;  %p245_p2 = scmp.lt.s32.totalorder %s239_s11, %s239_s11 }
   0x7   :  { %p246_p3 = por %p245_p2, %p244_p1 }
   0x9   :  { %p247_p4 = pnand %p246_p3, %p240_p0 }
   0xb   :  { %250 = shalt.err (!%p247_p4)
}
   0xc   :  { %s298_s12 = smov 64   ;;  %s299_s13 = smov 4  }
   0xd   :  { %21 = dma.hbm_to_vmem [thread:$0]  %s328_s0, 256, %s16_s10, [#allocation4], %s298_s12, %s298_s12, %s299_s13  }
   0xe   :  { %s300_s16 = smov [#allocation6]  }
   0xf   :  { %s27_s17 = sshll.u32 %s300_s16, 4  ;;  %s28_s17 = int_to_ptr.vmem [resolvable:$true] %s27_s17 }
  0x10   :  { %s259_s18 = scalar_lea.vmem %s28_s17, 512  ;;  %p264_p6 = scmp.lt.s32.totalorder %s28_s17, %s28_s17 }
  0x11   :  { %p260_p5 = scmp.ne.s32.totalorder %s28_s17, %s259_s18  ;;  %p265_p7 = scmp.lt.s32.totalorder %s259_s18, %s259_s18 }
  0x13   :  { %p266_p8 = por %p265_p7, %p264_p6 }
  0x15   :  { %p267_p9 = pnand %p266_p8, %p260_p5 }
  0x17   :  { %270 = shalt.err (!%p267_p9)
}
  0x18   :  { %33 = dma.hbm_to_vmem [thread:$0]  %s329_s1, 512, %s28_s17, [#allocation7], %s298_s12, %s298_s12, %s299_s13  }
  0x19   :  { %291 = dma.done.wait [#allocation4], 256  }
  0x1a   :  { %292 = vsyncadd [#allocation4], 4294967040 }
  0x1b   :  { %293 = dma.done.wait [#allocation7], 512  }
  0x1c   :  { %294 = vsyncadd [#allocation7], 4294966784  ;;  %v225_v0 = vld [vmem:[#allocation6 + $0x18] sm:$0xff]   ;;  %v226_v1 = vld [vmem:[#allocation6 + $0x10] sm:$0xff]   ;;  %vm99_vm0 = vcmask 523264   ;;  %s301_s0 = smov [#allocation8]  }
  0x1d   :  { %206 = vmatprep.subr.bf16.mxu0 %v225_v0  ;;  %v227_v2 = vld [vmem:[#allocation6 + $0x8] sm:$0xff]   ;;  %v229_v3 = vld [vmem:[#allocation3] sm:$0xff]   ;;  %v228_v4 = vld [vmem:[#allocation6] sm:$0xff]   ;;  %s179_s1 = sshll.u32 %s301_s0, 4  ;;  %s180_s1 = int_to_ptr.vmem [resolvable:$true] %s179_s1 }
  0x1e   :  { %207 = vmatpush3.bf16.msra.mxu0 %v225_v0  ;;  %214 = vmatprep.mubr.msk.bf16.mxu0 %vm99_vm0, %v229_v3  ;;  %v230_v5 = vld [vmem:[#allocation3 + $0x8] sm:$0xff]   ;;  %s271_s21 = scalar_lea.vmem %s180_s1, 512  ;;  %p276_p11 = scmp.lt.s32.totalorder %s180_s1, %s180_s1 }
  0x1f   :  { %208 = vmatprep.subr.bf16.mxu0 %v226_v1  ;;  %p272_p10 = scmp.ne.s32.totalorder %s180_s1, %s271_s21  ;;  %p277_p12 = scmp.lt.s32.totalorder %s271_s21, %s271_s21 }
  0x21   :  { %p278_p13 = por %p277_p12, %p276_p11 }
  0x22   :  { %209 = vmatpush3.bf16.msra.mxu0 %v226_v1 }
  0x23   :  { %210 = vmatprep.subr.bf16.mxu0 %v227_v2  ;;  %p279_p0 = pnand %p278_p13, %p272_p10 }
  0x26   :  { %211 = vmatpush3.bf16.msra.mxu0 %v227_v2 }
  0x27   :  { %212 = vmatprep.subr.bf16.mxu0 %v228_v4 }
  0x2a   :  { %213 = vmatpush3.bf16.msra.mxu0 %v228_v4 }
  0x2d   :  { %215 = vmatmul.mubr.msk.bf16.vlgmr.msra.gmra.mxu0 %vm99_vm0, %v230_v5 }
  0xed   :  { %v216_v6 = vpop.f32.mrf.mxu0 }
  0xee   :  { %172 = vst [vmem:[#allocation8 + $0x10] sm:$0xff] %v216_v6 }
  0xef   :  { %v140_v7 = vpop.f32.mrf.mxu0 }
  0xf0   :  { %170 = vst [vmem:[#allocation8] sm:$0xff] %v140_v7 }
  0xf1   :  { %v217_v8 = vpop.f32.mrf.mxu0 }
  0xf2   :  { %173 = vst [vmem:[#allocation8 + $0x18] sm:$0xff] %v217_v8 }
  0xf3   :  { %v143_v9 = vpop.f32.mrf.mxu0 }
  0xf4   :  { %171 = vst [vmem:[#allocation8 + $0x8] sm:$0xff] %v143_v9 }
  0xf5   :  { %282 = shalt.err (!%p279_p0)
}
  0xf6   :  { %s302_s22 = smov 128   ;;  %s303_s23 = smov 8  }
  0xf7   :  { %185 = dma.vmem_to_hbm [thread:$0]  %s180_s1, 512, %s330_s2, [#allocation5], %s302_s22, %s302_s22, %s303_s23  }
  0xf8   :  { %295 = dma.done.wait [#allocation5], 512  }
  0xf9   :  { %296 = vsyncadd [#allocation5], 4294966784 }
  0xfa   :  { %189 = vsyncpa [#allocation4], 1 }
  0xfb   :  { %190 = vsyncpa [#allocation7], 1 }
  0xfc   :  { %191 = vsyncpa [#allocation5], 1 }

</bundles_post_ra>
